<compile_context>
chip_gen: v6e
topology: v6e:2x2x1
jax: 0.10.0
libtpu: 0.0.40
codegen_flags: <defaults>
</compile_context>

<pallas_src>
import jax
import jax.numpy as jnp
from jax.experimental import pallas as pl
from jax.experimental.pallas import tpu as pltpu

LANE = 128
TARGET_BLOCK_BYTES = 2 * 1024 * 1024  # ~2 MiB per block


def _expand_time_kernel(x_ref, o_ref):
    # Pure copy: write the current input row-block into output slot (t, block).
    o_ref[...] = x_ref[...]


def _pick_cols(total: int) -> int:
    """Largest lane-dense width that divides the flat size (0 -> needs pad)."""
    for c in (4096, 2048, 1024, 512, 256, 128):
        if total % c == 0:
            return c
    return 0


def expand_time(x: jax.Array, T: int) -> jax.Array:
    """ExpandTime forward: x (N, C, H, W) -> (T*N, C, H, W), T stacked copies."""
    assert T >= 1
    orig_shape = x.shape
    dtype = x.dtype
    total = x.size

    cols = _pick_cols(total)
    if cols == 0:
        # Fallback for sizes not divisible by 128: pad the flat view.
        # TODO(synk): handle the ragged tail in-kernel to avoid this extra HBM pass.
        cols = LANE
        padded = pl.cdiv(total, cols) * cols
        xf = jnp.pad(x.reshape(-1), (0, padded - total))
    else:
        padded = total
        xf = x.reshape(-1)

    rows = padded // cols
    elem_bytes = jnp.dtype(dtype).itemsize
    # Row-block sized to ~TARGET_BLOCK_BYTES, multiple of 8 sublanes (or the
    # full row extent if the array is small).
    block_rows = max(8, (TARGET_BLOCK_BYTES // (cols * elem_bytes)) // 8 * 8)
    block_rows = min(block_rows, rows)

    x2d = xf.reshape(rows, cols)
    n_row_blocks = pl.cdiv(rows, block_rows)
    grid = (T, n_row_blocks)

    out3d = pl.pallas_call(
        _expand_time_kernel,
        out_shape=jax.ShapeDtypeStruct((T, rows, cols), dtype),
        grid=grid,
        in_specs=[
            # Same input block for every t: reads are re-streamed per copy.
            pl.BlockSpec((block_rows, cols), lambda t, i: (i, 0)),
        ],
        out_specs=pl.BlockSpec((None, block_rows, cols), lambda t, i: (t, i, 0)),
        compiler_params=pltpu.CompilerParams(
            dimension_semantics=("parallel", "parallel")),
    )(x2d)

    if padded != total:
        out_flat = out3d.reshape(T, padded)[:, :total]
    else:
        out_flat = out3d.reshape(T, total)
    out = out_flat.reshape(T * orig_shape[0], *orig_shape[1:])
    # TODO(synk): forward-only kernel; the VJP (sum over the T copies) is not
    # wired up via custom_vjp here.
    return out


def expand_time_ref(x: jax.Array, T: int) -> jax.Array:
    """Pure-JAX reference matching the PyTorch module."""
    x_seq = jnp.broadcast_to(x[None], (T,) + x.shape)
    return x_seq.reshape(-1, *x.shape[1:])


if __name__ == "__main__":
    key = jax.random.PRNGKey(0)
    # Small NCHW input consistent with a conv-net spiking layer.
    x = jax.random.normal(key, (2, 4, 16, 16), dtype=jnp.float32)
    T = 4  # number of time steps to expand to

    out = expand_time(x, T)
    out = jax.block_until_ready(out)

    ref = expand_time_ref(x, T)
    assert out.shape == (T * x.shape[0],) + x.shape[1:], (out.shape, ref.shape)
    assert out.dtype == x.dtype
    assert jnp.array_equal(out, ref), float(jnp.max(jnp.abs(out - ref)))

    print("KERNEL_OK")
</pallas_src>

<mosaic_0001>
module attributes {stable_mosaic.version = 11 : i64} {
  func.func @_expand_time_kernel(%arg0: i32, %arg1: i32, %arg2: memref<1x2048xf32, #tpu.memory_space<vmem>>, %arg3: memref<1x1x2048xf32, #tpu.memory_space<vmem>>) attributes {dimension_semantics = [#tpu.dimension_semantics<parallel>, #tpu.dimension_semantics<parallel>], iteration_bounds = array<i64: 4, 1>, scalar_prefetch = 0 : i64, scratch_operands = 0 : i64, tpu.core_type = #tpu.core_type<tc>, window_params = [{transform_indices = @transform_0, window_bounds = array<i64: 1, 2048>}, {transform_indices = @transform_1, window_bounds = array<i64: 1, 1, 2048>}]} {
    %c0 = arith.constant 0 : index
    %c0_0 = arith.constant 0 : index
    %0 = vector.load %arg2[%c0, %c0_0] : memref<1x2048xf32, #tpu.memory_space<vmem>>, vector<1x2048xf32>
    %c0_1 = arith.constant 0 : index
    %c0_2 = arith.constant 0 : index
    %c0_3 = arith.constant 0 : index
    %1 = vector.load %arg3[%c0_1, %c0_2, %c0_3] : memref<1x1x2048xf32, #tpu.memory_space<vmem>>, vector<1x1x2048xf32>
    %2 = vector.shape_cast %1 : vector<1x1x2048xf32> to vector<1x2048xf32>
    %3 = vector.shape_cast %0 : vector<1x2048xf32> to vector<1x1x2048xf32>
    tpu.vector_store %arg3[%c0_1, %c0_2, %c0_3], %3 {strides = array<i32>} : memref<1x1x2048xf32, #tpu.memory_space<vmem>>, vector<1x1x2048xf32>,
    return
  }
  func.func @transform_0(%arg0: i32, %arg1: i32) -> (i32, i32) {
    %c0_i32 = arith.constant 0 : i32
    %c0_i32_0 = arith.constant 0 : i32
    return %arg1, %c0_i32 : i32, i32
  }
  func.func @transform_1(%arg0: i32, %arg1: i32) -> (i32, i32, i32) {
    %c0_i32 = arith.constant 0 : i32
    %c0_i32_0 = arith.constant 0 : i32
    return %arg0, %arg1, %c0_i32 : i32, i32, i32
  }
}

</mosaic_0001>

<bundles_post_ra>
// kernel: tpu_custom_call.1
= control target key start
LH: loop header
LB: loop body
LE: loop exit
PB: predicated region body
PF: predicated region fallthrough
CT: control target
= control target key end

     0   :  { %6 = vsyncpa [#allocation3], 0  ;;  %s549_s0 = inlined_call_operand.hbm [shape: f32[1,2048], index: 0, kind: input, shape index: {}]   ;;  %s550_s1 = inlined_call_operand.hbm [shape: f32[4,1,2048], index: 1, kind: output, shape index: {}]  }
   0x1   :  { %7 = vsyncpa [#allocation4], 0 }
   0x2   :  { %9 = vsyncpa [#allocation4 + $0x1], 0  ;;  %s422_s6 = smov 0   ;;  %s424_s7 = smov 0  }
   0x3   :  { %s426_s8 = smov 0   ;;  %s428_s9 = smov 0  }
   0x4   :  { %s430_s10 = smov 0   ;;  %s432_s11 = smov 0  }
   0x5 LB: > { %s223_s12 = sadd.s32 4294967295, %s408_s11   ;;  %s224_s13 = sadd.s32 4294967294, %s408_s11   ;;  %s408_s11 = sphi %s432_s11, %s15_s11   ;;  %s404_s10 = sphi %s430_s10, %s559_s10   ;;  %s400_s9 = sphi %s428_s9, %s558_s9   ;;  %s396_s8 = sphi %s426_s8, %s557_s8   ;;  %s392_s7 = sphi %s424_s7, %s556_s7   ;;  %s388_s6 = sphi %s422_s6, %s555_s6  }
   0x6   : > { %s27_s14 = sadd.s32 1, %s404_s10  ;;  %s62_s15 = sadd.s32 1, %s396_s8 }
   0x7   : > { %p29_p0 = scmp.ge.s32.totalorder %s27_s14, 4  ;;  %p72_p1 = scmp.ne.s32.totalorder %s396_s8, %s392_s7 }
   0x8   : > { %p73_p2 = scmp.eq.s32.totalorder %s223_s12, 3  ;;  %p78_p3 = scmp.ne.s32.totalorder %s392_s7, %s388_s6 }
   0x9   : > { %s561_s14 = smov (%p29_p0, %s27_s14), 0  ;;  %p79_p5 = scmp.eq.s32.totalorder %s224_s13, 3 }
   0xa   : > { %p462_p4 = por %p73_p2, %p72_p1  ;;  %s57_s17 = ssub.s32 %s404_s10, %s561_s14 }
   0xb   : > { %p225_p6 = scmp.ge.s32.totalorder %s408_s11, 1  ;;  %p60_p7 = scmp.eq.s32.totalorder %s57_s17, 0 }
   0xc   : > { %p469_p8 = por %p79_p5, %p78_p3  ;;  %p86_p9 = scmp.lt.s32.totalorder %s408_s11, 5 }
   0xd   : > { %s475_s19 = scalar_select %p60_p7, %s396_s8, %s62_s15  }
   0xe   : > { %p477_p10 = pnand %p225_p6, %p86_p9  ;;  %p481_p11 = scmp.eq.s32.totalorder %s223_s12, 0 }
   0xf   : > { %s410_s22 = smov [#allocation2]  }
  0x10   : > { %p242_p12 = pneg %p477_p10  ;;  %s102_s23 = sshll.u32 %s410_s22, 4  ;;  %s103_s23 = int_to_ptr.vmem [resolvable:$true] %s102_s23 }
  0x11   : > { %s313_s24 = scalar_lea.vmem %s103_s23, 256  ;;  %p321_p5 = scmp.lt.s32.totalorder %s103_s23, %s103_s23 }
  0x12   : > { %p243_p13 = pnand %p481_p11, %p242_p12  ;;  %p314_p1 = scmp.ne.s32.totalorder %s103_s23, %s313_s24 }
  0x13   : > { %p322_p6 = scmp.lt.s32.totalorder %s313_s24, %s313_s24 }
  0x14   : > { %p304_p0 = pneg %p243_p13 }
  0x15   : > { %p323_p7 = por %p322_p6, %p321_p5 }
  0x16   : > { %p316_p2 = pnand %p314_p1, %p304_p0 }
  0x18   : > { %p317_p3 = pneg %p316_p2 }
  0x1a   : > { %p324_p9 = pnand %p323_p7, %p317_p3 }
  0x1c   : > { %327 = shalt.err (!%p324_p9)
}
  0x1d   : > { %245 = dma.hbm_to_vmem [thread:$0]  (!%p243_p13), %s549_s0, 256, %s103_s23, [#allocation3]  }
  0x1e   : > { %115 = sbr.rel (%p477_p10) target bundleno = 61 (0x3d), region = 24 }
  0x23   : > { %379 = dma.done.wait (%p481_p11), [#allocation3], 256  }
  0x24   : > { %381 = vsyncadd (%p481_p11), [#allocation3], 4294967040  ;;  %s127_s27 = sand.u32 1, %s392_s7   ;;  %s235_s2 = sshll.u32 %s400_s9, 8  ;;  %v130_v0 = vld [vmem:[#allocation2] sm:$0xff]  ;;  %v131_v1 = vld [vmem:[#allocation2 + $0x8] sm:$0xff] }
  0x25   : > { %s229_s28 = sshll.u32 %s127_s27, 4  ;;  %s505_s5 = scalar_lea.hbm %s550_s1, %s235_s2 }
  0x26   : > { %s129_s29 = scalar_lea.vmem [#allocation5], %s229_s28  ;;  %s135_s12 = scalar_lea.sflag [#allocation4], %s127_s27 }
  0x27   : > { %s151_s30 = sshll.u32 %s129_s29, 4  ;;  %132 = vst [vmem:[%s129_s29] sm:$0xff] %v130_v0  ;;  %133 = vst [vmem:[%s129_s29 + $0x8] sm:$0xff] %v131_v1  ;;  %s411_s9 = smov [#allocation5]   ;;  %s500_s30 = int_to_ptr.vmem [resolvable:$true] %s151_s30 }
  0x28   : > { %s328_s13 = scalar_lea.vmem %s500_s30, 256  ;;  %s332_s15 = sshll.u32 %s411_s9, 4  ;;  %s333_s15 = int_to_ptr.vmem [resolvable:$false] %s332_s15 }
  0x29   : > { %p329_p10 = scmp.ne.s32.totalorder %s500_s30, %s328_s13  ;;  %s334_s17 = scalar_lea.vmem %s333_s15, 512 }
  0x2a   : > { %p335_p13 = scmp.lt.s32.totalorder %s500_s30, %s333_s15  ;;  %p336_p0 = scmp.lt.s32.totalorder %s334_s17, %s328_s13 }
  0x2b   : > { %p330_p11 = pnand %p329_p10, %p462_p4 }
  0x2c   : > { %p337_p1 = por %p336_p0, %p335_p13 }
  0x2d   : > { %p331_p12 = pneg %p330_p11 }
  0x2f   : > { %p338_p2 = pnand %p337_p1, %p331_p12 }
  0x31   : > { %341 = shalt.err (!%p338_p2)
}
  0x32   : > { %s342_s20 = scalar_lea.hbm %s505_s5, 256  ;;  %s346_s23 = scalar_lea.hbm %s550_s1, 1024 }
  0x33   : > { %p343_p3 = scmp.ne.s32.totalorder %s505_s5, %s342_s20  ;;  %p347_p7 = scmp.lt.s32.totalorder %s505_s5, %s550_s1 }
  0x34   : > { %p348_p9 = scmp.lt.s32.totalorder %s346_s23, %s342_s20 }
  0x35   : > { %p344_p5 = pnand %p343_p3, %p462_p4 }
  0x36   : > { %p349_p10 = por %p348_p9, %p347_p7 }
  0x37   : > { %p345_p6 = pneg %p344_p5 }
  0x39   : > { %p350_p11 = pnand %p349_p10, %p345_p6 }
  0x3b   : > { %353 = shalt.err (!%p350_p11)
}
  0x3c   : > { %240 = dma.vmem_to_hbm [thread:$0]  (%p462_p4), %s500_s30, 256, %s505_s5, %s135_s12  }
  0x3d PF: > { %p252_p12 = scmp.ge.s32.totalorder %s408_s11, 2  ;;  %s163_s26 = sand.u32 1, %s388_s6  }
  0x3e   : > { %s164_s27 = scalar_lea.sflag [#allocation4], %s163_s26 }
  0x3f   : > { %p247_p13 = pnand %p252_p12, %p469_p8 }
  0x41   : > { %p248_p0 = pneg %p247_p13 }
  0x43   : > { %383 = dma.done.wait (%p248_p0), %s164_s27, 256  }
  0x44   : > { %385 = vsyncadd (%p248_p0), %s164_s27, 4294967040  ;;  %s15_s11 = sadd.s32 1, %s408_s11   ;;  %s555_s6 = smov %s392_s7 }
  0x45   : > { %p12_p1 = scmp.ge.s32.totalorder %s15_s11, 6   ;;  %s556_s7 = smov %s396_s8 }
  0x46   : > { %s557_s8 = smov %s475_s19  ;;  %s558_s9 = smov %s404_s10 }
  0x47   : > { %s559_s10 = smov %s561_s14  ;;  %14 = sbr.rel (!%p12_p1) target bundleno = 5 (0x5), region = 62 }
  0x4c   :  { %169 = vsyncpa [#allocation3], 1 }
  0x4d   :  { %171 = vsyncpa [#allocation3 + $0x1], 1 }
  0x4e   :  { %172 = vsyncpa [#allocation4], 1 }
  0x4f   :  { %174 = vsyncpa [#allocation4 + $0x1], 1 }

</bundles_post_ra>
